<compile_context>
chip_gen: v6e
topology: v6e:2x2x1
jax: 0.10.0
libtpu: 0.0.40
codegen_flags: <defaults>
</compile_context>

<pallas_src>
import functools

import jax
import jax.numpy as jnp
from jax import lax
from jax.experimental import pallas as pl
from jax.experimental.pallas import tpu as pltpu

LN_EPS = 1e-5  # torch.nn.LayerNorm default eps


def _round_up(n, m):
    return ((n + m - 1) // m) * m


# ---------------------------------------------------------------------------
# Kernel
# ---------------------------------------------------------------------------
def _encoder_kernel(x_ref,
                    w1_ref, b1_ref, g1_ref, be1_ref,
                    w2_ref, b2_ref, g2_ref, be2_ref,
                    w3_ref, b3_ref,
                    o_ref, *, dims, matmul_dtype):
    """Fused (Linear + ReLU + LayerNorm [+ Dropout=id]) x2 -> Linear on one (tb, d_in) tile."""

    def linear_relu_ln(h, w_ref, b_ref, g_ref, be_ref, n_true, n_pad):
        # Linear: narrow operands, f32 accumulation on the MXU.  Zero-padded weight
        # cols / bias lanes keep padded output lanes exactly 0.
        h = jnp.dot(h.astype(matmul_dtype), w_ref[...],
                    preferred_element_type=jnp.float32) + b_ref[...]
        h = jnp.maximum(h, 0.0)                       # ReLU; padded lanes stay exactly 0
        # LayerNorm over the TRUE feature count, mask-free: padded lanes of h are 0,
        # so they contribute (n_pad - n_true) * mu^2 to sum((h - mu)^2); subtract it
        # back with one scalar FMA per row (no iota / compare / select).
        inv_n = jnp.float32(1.0 / n_true)
        mu = jnp.sum(h, axis=-1, keepdims=True) * inv_n
        d = h - mu                                    # padded lanes == -mu
        var = (jnp.sum(d * d, axis=-1, keepdims=True)
               - jnp.float32(n_pad - n_true) * (mu * mu)) * inv_n
        # gamma/beta are zero-padded -> padded lanes land back at exactly 0.
        return d * lax.rsqrt(var + LN_EPS) * g_ref[...] + be_ref[...]
        # Dropout: identity (eval mode).

    h = linear_relu_ln(x_ref[...], w1_ref, b1_ref, g1_ref, be1_ref,
                       dims["h1"], dims["h1_p"])
    h = linear_relu_ln(h, w2_ref, b2_ref, g2_ref, be2_ref,
                       dims["h2"], dims["h2_p"])
    # Final Linear straight to the TRUE output width (w3 has true N = d_out).
    out = jnp.dot(h.astype(matmul_dtype), w3_ref[...],
                  preferred_element_type=jnp.float32) + b3_ref[...]
    o_ref[...] = out.astype(o_ref.dtype)


# ---------------------------------------------------------------------------
# One-time parameter packing (transpose + pad hidden dims to 128 + dtype cast)
# ---------------------------------------------------------------------------
def pack_params(params, matmul_dtype=jnp.bfloat16):
    """torch-shaped params -> MXU-friendly packed params. Call once at load time."""
    d_in, h1 = params["w1"].shape[1], params["w1"].shape[0]
    h2, d_out = params["w2"].shape[0], params["w3"].shape[0]
    h1_p, h2_p = _round_up(h1, 128), _round_up(h2, 128)

    def pad_w(w, rows_p, cols_p):   # torch [out, in] -> padded [rows_p, cols_p] (= [K, N])
        wt = w.T.astype(matmul_dtype)
        return jnp.pad(wt, ((0, rows_p - wt.shape[0]), (0, cols_p - wt.shape[1])))

    def pad_v(v, cols_p):           # 1-D -> zero-padded [1, cols_p] f32 row
        return jnp.pad(v.astype(jnp.float32), (0, cols_p - v.shape[0]))[None, :]

    packed = dict(
        w1=pad_w(params["w1"], d_in, h1_p),     # true K = d_in: x stays unpadded in HBM
        b1=pad_v(params["b1"], h1_p),
        g1=pad_v(params["ln1_w"], h1_p),
        be1=pad_v(params["ln1_b"], h1_p),
        w2=pad_w(params["w2"], h1_p, h2_p),
        b2=pad_v(params["b2"], h2_p),
        g2=pad_v(params["ln2_w"], h2_p),
        be2=pad_v(params["ln2_b"], h2_p),
        w3=pad_w(params["w3"], h2_p, d_out),    # true N = d_out: out stays unpadded in HBM
        b3=pad_v(params["b3"], d_out),
    )
    dims = dict(d_in=d_in, h1=h1, h2=h2, d_out=d_out, h1_p=h1_p, h2_p=h2_p)
    return packed, dims


# ---------------------------------------------------------------------------
# Wrapper
# ---------------------------------------------------------------------------
def _resident_spec(shape):
    """Grid-invariant parameter block: constant index_map, single VMEM buffer."""
    try:
        return pl.BlockSpec(shape, lambda i: (0, 0), pipeline_mode=pl.Buffered(1))
    except TypeError:   # pipeline_mode unavailable -> fall back to default buffering
        return pl.BlockSpec(shape, lambda i: (0, 0))


def alternate_feature_encoder(x, packed, dims, *, matmul_dtype=jnp.bfloat16,
                              block_b=2048, out_dtype=None):
    """x: [..., input_size]. packed/dims from pack_params(). Returns [..., output_size]."""
    out_dtype = x.dtype if out_dtype is None else jnp.dtype(out_dtype)
    lead, d_in = x.shape[:-1], x.shape[-1]
    assert d_in == dims["d_in"]
    d_out = dims["d_out"]

    x = x.reshape(-1, d_in)
    B = x.shape[0]

    # Ship x in the matmul dtype (bf16 path halves the input DMA bytes).
    # In production this cast should be fused into the producer of x.
    if x.dtype != matmul_dtype:
        x = x.astype(matmul_dtype)

    # Batch tile: large (amortizes ~0.35us per-grid-step overhead), 8-row aligned, and
    # capped at ceil(B/2) so the "parallel" axis has >= 2 steps for v7x's two
    # TensorCores whenever the batch is big enough to split.
    if B <= 8:
        tb = B
    else:
        tb = max(8, min(block_b, _round_up(pl.cdiv(B, 2), 8)))
    grid = (pl.cdiv(B, tb),)   # ragged edge block handled by Pallas (no host-side pad)

    p_order = ("w1", "b1", "g1", "be1", "w2", "b2", "g2", "be2", "w3", "b3")
    p_args = [packed[k] for k in p_order]
    resident_specs = [_resident_spec(v.shape) for v in p_args]

    # Advisory cost estimate from TRUE dims and stored HBM widths.
    flops = 2 * B * (dims["d_in"] * dims["h1"]
                     + dims["h1"] * dims["h2"]
                     + dims["h2"] * d_out)
    bytes_accessed = (int(x.size) * x.dtype.itemsize
                      + B * d_out * jnp.dtype(out_dtype).itemsize
                      + sum(int(v.size) * v.dtype.itemsize for v in p_args))

    out = pl.pallas_call(
        functools.partial(_encoder_kernel, dims=dims, matmul_dtype=matmul_dtype),
        out_shape=jax.ShapeDtypeStruct((B, d_out), out_dtype),
        grid=grid,
        in_specs=[pl.BlockSpec((tb, d_in), lambda i: (i, 0))] + resident_specs,
        out_specs=pl.BlockSpec((tb, d_out), lambda i: (i, 0)),
        compiler_params=pltpu.CompilerParams(
            dimension_semantics=("parallel",)),
        cost_estimate=pl.CostEstimate(flops=int(flops), transcendentals=2 * B,
                                      bytes_accessed=int(bytes_accessed)),
    )(x, *p_args)

    return out.reshape(*lead, d_out)


# ---------------------------------------------------------------------------
# Pure-JAX reference (eval mode) + deterministic init
# ---------------------------------------------------------------------------
def _ref_forward(x, params):
    hp = lax.Precision.HIGHEST
    h = x
    for (w, b, g, be) in [(params["w1"], params["b1"], params["ln1_w"], params["ln1_b"]),
                          (params["w2"], params["b2"], params["ln2_w"], params["ln2_b"])]:
        h = jnp.dot(h, w.T, precision=hp) + b
        h = jnp.maximum(h, 0.0)
        mu = jnp.mean(h, axis=-1, keepdims=True)
        var = jnp.mean((h - mu) ** 2, axis=-1, keepdims=True)
        h = (h - mu) / jnp.sqrt(var + LN_EPS) * g + be
    return jnp.dot(h, params["w3"].T, precision=hp) + params["b3"]


def _init_params(key, input_size, layer_sizes, output_size):
    """Deterministic init mimicking torch default shapes (W: [out, in])."""
    sizes = [input_size] + list(layer_sizes)
    keys = jax.random.split(key, 6)
    params = {}
    params["w1"] = jax.random.normal(keys[0], (sizes[1], sizes[0]), jnp.float32) * 0.1
    params["b1"] = jax.random.normal(keys[1], (sizes[1],), jnp.float32) * 0.1
    params["ln1_w"] = jnp.ones((sizes[1],), jnp.float32)
    params["ln1_b"] = jnp.zeros((sizes[1],), jnp.float32)
    params["w2"] = jax.random.normal(keys[2], (sizes[2], sizes[1]), jnp.float32) * 0.1
    params["b2"] = jax.random.normal(keys[3], (sizes[2],), jnp.float32) * 0.1
    params["ln2_w"] = jnp.ones((sizes[2],), jnp.float32)
    params["ln2_b"] = jnp.zeros((sizes[2],), jnp.float32)
    params["w3"] = jax.random.normal(keys[4], (output_size, sizes[2]), jnp.float32) * 0.1
    params["b3"] = jax.random.normal(keys[5], (output_size,), jnp.float32) * 0.1
    return params


if __name__ == "__main__":
    key = jax.random.PRNGKey(0)
    k_x, k_p, k_big = jax.random.split(key, 3)

    batch = 8
    input_size = 32
    layer_sizes = (64, 64)
    output_size = 32

    x = jax.random.normal(k_x, (batch, input_size), jnp.float32)
    params = _init_params(k_p, input_size, layer_sizes, output_size)
    y_ref = _ref_forward(x, params)

    # 1) f32-operand path (test flag only; structural parity with the f32 reference).
    packed_f32, dims = pack_params(params, matmul_dtype=jnp.float32)
    y_f32 = jax.block_until_ready(
        alternate_feature_encoder(x, packed_f32, dims, matmul_dtype=jnp.float32))
    assert y_f32.shape == (batch, output_size)
    assert jnp.allclose(y_f32, y_ref, atol=3e-2, rtol=3e-2), "f32 mismatch vs reference"

    # 2) Production path: bf16 operands (x shipped as bf16), f32 accumulation / LN math.
    packed_bf16, _ = pack_params(params, matmul_dtype=jnp.bfloat16)
    y_bf16 = jax.block_until_ready(
        alternate_feature_encoder(x, packed_bf16, dims))
    assert y_bf16.shape == (batch, output_size)
    assert jnp.allclose(y_bf16, y_ref, atol=1e-1, rtol=5e-2), "bf16 mismatch vs reference"

    # 3) Ragged batch: multi-step "parallel" grid + Pallas-handled partial edge block.
    x_big = jax.random.normal(k_big, (300, input_size), jnp.float32)
    y_big = jax.block_until_ready(
        alternate_feature_encoder(x_big, packed_f32, dims,
                                  matmul_dtype=jnp.float32, block_b=128))
    assert y_big.shape == (300, output_size)
    assert jnp.allclose(y_big, _ref_forward(x_big, params), atol=3e-2, rtol=3e-2), \
        "ragged-grid mismatch vs reference"

    print("KERNEL_OK")
</pallas_src>

<mosaic_0001>
module attributes {stable_mosaic.version = 11 : i64} {
  func.func @_encoder_kernel(%arg0: i32, %arg1: memref<8x32xf32, #tpu.memory_space<vmem>>, %arg2: memref<32x128xf32, #tpu.memory_space<vmem>>, %arg3: memref<1x128xf32, #tpu.memory_space<vmem>>, %arg4: memref<1x128xf32, #tpu.memory_space<vmem>>, %arg5: memref<1x128xf32, #tpu.memory_space<vmem>>, %arg6: memref<128x128xf32, #tpu.memory_space<vmem>>, %arg7: memref<1x128xf32, #tpu.memory_space<vmem>>, %arg8: memref<1x128xf32, #tpu.memory_space<vmem>>, %arg9: memref<1x128xf32, #tpu.memory_space<vmem>>, %arg10: memref<128x32xf32, #tpu.memory_space<vmem>>, %arg11: memref<1x32xf32, #tpu.memory_space<vmem>>, %arg12: memref<8x32xf32, #tpu.memory_space<vmem>>) attributes {dimension_semantics = [#tpu.dimension_semantics<parallel>], iteration_bounds = array<i64: 1>, scalar_prefetch = 0 : i64, scratch_operands = 0 : i64, tpu.core_type = #tpu.core_type<tc>, window_params = [{transform_indices = @transform_0, window_bounds = array<i64: 8, 32>}, {pipeline_mode = #tpu.pipeline_mode<synchronous>, transform_indices = @transform_1, window_bounds = array<i64: 32, 128>}, {pipeline_mode = #tpu.pipeline_mode<synchronous>, transform_indices = @transform_2, window_bounds = array<i64: 1, 128>}, {pipeline_mode = #tpu.pipeline_mode<synchronous>, transform_indices = @transform_3, window_bounds = array<i64: 1, 128>}, {pipeline_mode = #tpu.pipeline_mode<synchronous>, transform_indices = @transform_4, window_bounds = array<i64: 1, 128>}, {pipeline_mode = #tpu.pipeline_mode<synchronous>, transform_indices = @transform_5, window_bounds = array<i64: 128, 128>}, {pipeline_mode = #tpu.pipeline_mode<synchronous>, transform_indices = @transform_6, window_bounds = array<i64: 1, 128>}, {pipeline_mode = #tpu.pipeline_mode<synchronous>, transform_indices = @transform_7, window_bounds = array<i64: 1, 128>}, {pipeline_mode = #tpu.pipeline_mode<synchronous>, transform_indices = @transform_8, window_bounds = array<i64: 1, 128>}, {pipeline_mode = #tpu.pipeline_mode<synchronous>, transform_indices = @transform_9, window_bounds = array<i64: 128, 32>}, {pipeline_mode = #tpu.pipeline_mode<synchronous>, transform_indices = @transform_10, window_bounds = array<i64: 1, 32>}, {transform_indices = @transform_11, window_bounds = array<i64: 8, 32>}]} {
    %c0 = arith.constant 0 : index
    %c0_0 = arith.constant 0 : index
    %0 = vector.load %arg1[%c0, %c0_0] : memref<8x32xf32, #tpu.memory_space<vmem>>, vector<8x32xf32>
    %c0_1 = arith.constant 0 : index
    %c0_2 = arith.constant 0 : index
    %1 = vector.load %arg2[%c0_1, %c0_2] : memref<32x128xf32, #tpu.memory_space<vmem>>, vector<32x128xf32>
    %cst = arith.constant dense<0.000000e+00> : vector<8x128xf32>
    %2 = tpu.matmul %0, %1, %cst {dimension_numbers = #tpu.dot_dimension_numbers<[1], [0], [0], [1], [0, 0, 1, 1], [], []>} : vector<8x32xf32>, vector<32x128xf32>, vector<8x128xf32> -> vector<8x128xf32>
    %c0_3 = arith.constant 0 : index
    %c0_4 = arith.constant 0 : index
    %3 = vector.load %arg3[%c0_3, %c0_4] : memref<1x128xf32, #tpu.memory_space<vmem>>, vector<1x128xf32>
    %4 = vector.broadcast %3 : vector<1x128xf32> to vector<8x128xf32>
    %5 = arith.addf %2, %4 : vector<8x128xf32>
    %cst_5 = arith.constant 0.000000e+00 : f32
    %6 = vector.broadcast %cst_5 : f32 to vector<8x128xf32>
    %7 = arith.maximumf %5, %6 : vector<8x128xf32>
    %cst_6 = arith.constant dense<0.000000e+00> : vector<8xf32>
    %8 = vector.multi_reduction <add>, %7, %cst_6 [1] : vector<8x128xf32> to vector<8xf32>
    %9 = vector.shape_cast %8 : vector<8xf32> to vector<8x1xf32>
    %cst_7 = arith.constant 1.562500e-02 : f32
    %10 = vector.broadcast %cst_7 : f32 to vector<8x1xf32>
    %11 = arith.mulf %9, %10 : vector<8x1xf32>
    %12 = vector.broadcast %11 : vector<8x1xf32> to vector<8x128xf32>
    %13 = arith.subf %7, %12 : vector<8x128xf32>
    %14 = arith.mulf %13, %13 : vector<8x128xf32>
    %cst_8 = arith.constant dense<0.000000e+00> : vector<8xf32>
    %15 = vector.multi_reduction <add>, %14, %cst_8 [1] : vector<8x128xf32> to vector<8xf32>
    %16 = vector.shape_cast %15 : vector<8xf32> to vector<8x1xf32>
    %17 = arith.mulf %11, %11 : vector<8x1xf32>
    %cst_9 = arith.constant 6.400000e+01 : f32
    %18 = vector.broadcast %cst_9 : f32 to vector<8x1xf32>
    %19 = arith.mulf %18, %17 : vector<8x1xf32>
    %20 = arith.subf %16, %19 : vector<8x1xf32>
    %cst_10 = arith.constant 1.562500e-02 : f32
    %21 = vector.broadcast %cst_10 : f32 to vector<8x1xf32>
    %22 = arith.mulf %20, %21 : vector<8x1xf32>
    %cst_11 = arith.constant 9.99999974E-6 : f32
    %23 = vector.broadcast %cst_11 : f32 to vector<8x1xf32>
    %24 = arith.addf %22, %23 : vector<8x1xf32>
    %25 = math.rsqrt %24 : vector<8x1xf32>
    %26 = vector.broadcast %25 : vector<8x1xf32> to vector<8x128xf32>
    %27 = arith.mulf %13, %26 : vector<8x128xf32>
    %c0_12 = arith.constant 0 : index
    %c0_13 = arith.constant 0 : index
    %28 = vector.load %arg4[%c0_12, %c0_13] : memref<1x128xf32, #tpu.memory_space<vmem>>, vector<1x128xf32>
    %29 = vector.broadcast %28 : vector<1x128xf32> to vector<8x128xf32>
    %30 = arith.mulf %27, %29 : vector<8x128xf32>
    %c0_14 = arith.constant 0 : index
    %c0_15 = arith.constant 0 : index
    %31 = vector.load %arg5[%c0_14, %c0_15] : memref<1x128xf32, #tpu.memory_space<vmem>>, vector<1x128xf32>
    %32 = vector.broadcast %31 : vector<1x128xf32> to vector<8x128xf32>
    %33 = arith.addf %30, %32 : vector<8x128xf32>
    %c0_16 = arith.constant 0 : index
    %c0_17 = arith.constant 0 : index
    %34 = vector.load %arg6[%c0_16, %c0_17] : memref<128x128xf32, #tpu.memory_space<vmem>>, vector<128x128xf32>
    %cst_18 = arith.constant dense<0.000000e+00> : vector<8x128xf32>
    %35 = tpu.matmul %33, %34, %cst_18 {dimension_numbers = #tpu.dot_dimension_numbers<[1], [0], [0], [1], [0, 0, 1, 1], [], []>} : vector<8x128xf32>, vector<128x128xf32>, vector<8x128xf32> -> vector<8x128xf32>
    %c0_19 = arith.constant 0 : index
    %c0_20 = arith.constant 0 : index
    %36 = vector.load %arg7[%c0_19, %c0_20] : memref<1x128xf32, #tpu.memory_space<vmem>>, vector<1x128xf32>
    %37 = vector.broadcast %36 : vector<1x128xf32> to vector<8x128xf32>
    %38 = arith.addf %35, %37 : vector<8x128xf32>
    %cst_21 = arith.constant 0.000000e+00 : f32
    %39 = vector.broadcast %cst_21 : f32 to vector<8x128xf32>
    %40 = arith.maximumf %38, %39 : vector<8x128xf32>
    %cst_22 = arith.constant dense<0.000000e+00> : vector<8xf32>
    %41 = vector.multi_reduction <add>, %40, %cst_22 [1] : vector<8x128xf32> to vector<8xf32>
    %42 = vector.shape_cast %41 : vector<8xf32> to vector<8x1xf32>
    %cst_23 = arith.constant 1.562500e-02 : f32
    %43 = vector.broadcast %cst_23 : f32 to vector<8x1xf32>
    %44 = arith.mulf %42, %43 : vector<8x1xf32>
    %45 = vector.broadcast %44 : vector<8x1xf32> to vector<8x128xf32>
    %46 = arith.subf %40, %45 : vector<8x128xf32>
    %47 = arith.mulf %46, %46 : vector<8x128xf32>
    %cst_24 = arith.constant dense<0.000000e+00> : vector<8xf32>
    %48 = vector.multi_reduction <add>, %47, %cst_24 [1] : vector<8x128xf32> to vector<8xf32>
    %49 = vector.shape_cast %48 : vector<8xf32> to vector<8x1xf32>
    %50 = arith.mulf %44, %44 : vector<8x1xf32>
    %cst_25 = arith.constant 6.400000e+01 : f32
    %51 = vector.broadcast %cst_25 : f32 to vector<8x1xf32>
    %52 = arith.mulf %51, %50 : vector<8x1xf32>
    %53 = arith.subf %49, %52 : vector<8x1xf32>
    %cst_26 = arith.constant 1.562500e-02 : f32
    %54 = vector.broadcast %cst_26 : f32 to vector<8x1xf32>
    %55 = arith.mulf %53, %54 : vector<8x1xf32>
    %cst_27 = arith.constant 9.99999974E-6 : f32
    %56 = vector.broadcast %cst_27 : f32 to vector<8x1xf32>
    %57 = arith.addf %55, %56 : vector<8x1xf32>
    %58 = math.rsqrt %57 : vector<8x1xf32>
    %59 = vector.broadcast %58 : vector<8x1xf32> to vector<8x128xf32>
    %60 = arith.mulf %46, %59 : vector<8x128xf32>
    %c0_28 = arith.constant 0 : index
    %c0_29 = arith.constant 0 : index
    %61 = vector.load %arg8[%c0_28, %c0_29] : memref<1x128xf32, #tpu.memory_space<vmem>>, vector<1x128xf32>
    %62 = vector.broadcast %61 : vector<1x128xf32> to vector<8x128xf32>
    %63 = arith.mulf %60, %62 : vector<8x128xf32>
    %c0_30 = arith.constant 0 : index
    %c0_31 = arith.constant 0 : index
    %64 = vector.load %arg9[%c0_30, %c0_31] : memref<1x128xf32, #tpu.memory_space<vmem>>, vector<1x128xf32>
    %65 = vector.broadcast %64 : vector<1x128xf32> to vector<8x128xf32>
    %66 = arith.addf %63, %65 : vector<8x128xf32>
    %c0_32 = arith.constant 0 : index
    %c0_33 = arith.constant 0 : index
    %67 = vector.load %arg10[%c0_32, %c0_33] : memref<128x32xf32, #tpu.memory_space<vmem>>, vector<128x32xf32>
    %cst_34 = arith.constant dense<0.000000e+00> : vector<8x32xf32>
    %68 = tpu.matmul %66, %67, %cst_34 {dimension_numbers = #tpu.dot_dimension_numbers<[1], [0], [0], [1], [0, 0, 1, 1], [], []>} : vector<8x128xf32>, vector<128x32xf32>, vector<8x32xf32> -> vector<8x32xf32>
    %c0_35 = arith.constant 0 : index
    %c0_36 = arith.constant 0 : index
    %69 = vector.load %arg11[%c0_35, %c0_36] : memref<1x32xf32, #tpu.memory_space<vmem>>, vector<1x32xf32>
    %70 = vector.broadcast %69 : vector<1x32xf32> to vector<8x32xf32>
    %71 = arith.addf %68, %70 : vector<8x32xf32>
    %c0_37 = arith.constant 0 : index
    %c0_38 = arith.constant 0 : index
    %72 = vector.load %arg12[%c0_37, %c0_38] : memref<8x32xf32, #tpu.memory_space<vmem>>, vector<8x32xf32>
    tpu.vector_store %arg12[%c0_37, %c0_38], %71 {strides = array<i32>} : memref<8x32xf32, #tpu.memory_space<vmem>>, vector<8x32xf32>,
    return
  }
  func.func @transform_0(%arg0: i32) -> (i32, i32) {
    %c0_i32 = arith.constant 0 : i32
    %c0_i32_0 = arith.constant 0 : i32
    return %arg0, %c0_i32 : i32, i32
  }
  func.func @transform_1(%arg0: i32) -> (i32, i32) {
    %c0_i32 = arith.constant 0 : i32
    %c0_i32_0 = arith.constant 0 : i32
    %c0_i32_1 = arith.constant 0 : i32
    return %c0_i32, %c0_i32_0 : i32, i32
  }
  func.func @transform_2(%arg0: i32) -> (i32, i32) {
    %c0_i32 = arith.constant 0 : i32
    %c0_i32_0 = arith.constant 0 : i32
    %c0_i32_1 = arith.constant 0 : i32
    return %c0_i32, %c0_i32_0 : i32, i32
  }
  func.func @transform_3(%arg0: i32) -> (i32, i32) {
    %c0_i32 = arith.constant 0 : i32
    %c0_i32_0 = arith.constant 0 : i32
    %c0_i32_1 = arith.constant 0 : i32
    return %c0_i32, %c0_i32_0 : i32, i32
  }
  func.func @transform_4(%arg0: i32) -> (i32, i32) {
    %c0_i32 = arith.constant 0 : i32
    %c0_i32_0 = arith.constant 0 : i32
    %c0_i32_1 = arith.constant 0 : i32
    return %c0_i32, %c0_i32_0 : i32, i32
  }
  func.func @transform_5(%arg0: i32) -> (i32, i32) {
    %c0_i32 = arith.constant 0 : i32
    %c0_i32_0 = arith.constant 0 : i32
    %c0_i32_1 = arith.constant 0 : i32
    return %c0_i32, %c0_i32_0 : i32, i32
  }
  func.func @transform_6(%arg0: i32) -> (i32, i32) {
    %c0_i32 = arith.constant 0 : i32
    %c0_i32_0 = arith.constant 0 : i32
    %c0_i32_1 = arith.constant 0 : i32
    return %c0_i32, %c0_i32_0 : i32, i32
  }
  func.func @transform_7(%arg0: i32) -> (i32, i32) {
    %c0_i32 = arith.constant 0 : i32
    %c0_i32_0 = arith.constant 0 : i32
    %c0_i32_1 = arith.constant 0 : i32
    return %c0_i32, %c0_i32_0 : i32, i32
  }
  func.func @transform_8(%arg0: i32) -> (i32, i32) {
    %c0_i32 = arith.constant 0 : i32
    %c0_i32_0 = arith.constant 0 : i32
    %c0_i32_1 = arith.constant 0 : i32
    return %c0_i32, %c0_i32_0 : i32, i32
  }
  func.func @transform_9(%arg0: i32) -> (i32, i32) {
    %c0_i32 = arith.constant 0 : i32
    %c0_i32_0 = arith.constant 0 : i32
    %c0_i32_1 = arith.constant 0 : i32
    return %c0_i32, %c0_i32_0 : i32, i32
  }
  func.func @transform_10(%arg0: i32) -> (i32, i32) {
    %c0_i32 = arith.constant 0 : i32
    %c0_i32_0 = arith.constant 0 : i32
    %c0_i32_1 = arith.constant 0 : i32
    return %c0_i32, %c0_i32_0 : i32, i32
  }
  func.func @transform_11(%arg0: i32) -> (i32, i32) {
    %c0_i32 = arith.constant 0 : i32
    %c0_i32_0 = arith.constant 0 : i32
    return %arg0, %c0_i32 : i32, i32
  }
}

</mosaic_0001>

<bundles_post_ra>
// kernel: tpu_custom_call.1
= control target key start
LH: loop header
LB: loop body
LE: loop exit
PB: predicated region body
PF: predicated region fallthrough
CT: control target
= control target key end

     0   :  { %16 = vsyncpa [#allocation3], 0  ;;  %s861_s0 = inlined_call_operand.vmem [shape: f32[8,32], index: 0, kind: input, shape index: {}]   ;;  %s862_s1 = inlined_call_operand.vmem [shape: f32[32,128], index: 1, kind: input, shape index: {}]   ;;  %s863_s2 = inlined_call_operand.vmem [shape: f32[1,128], index: 2, kind: input, shape index: {}]   ;;  %s864_s3 = inlined_call_operand.hbm [shape: f32[1,128], index: 3, kind: input, shape index: {}]   ;;  %s865_s4 = inlined_call_operand.hbm [shape: f32[1,128], index: 4, kind: input, shape index: {}]   ;;  %s866_s5 = inlined_call_operand.vmem [shape: f32[128,128], index: 5, kind: input, shape index: {}]   ;;  %s867_s6 = inlined_call_operand.vmem [shape: f32[1,128], index: 6, kind: input, shape index: {}]   ;;  %s868_s7 = inlined_call_operand.vmem [shape: f32[1,128], index: 7, kind: input, shape index: {}]   ;;  %s869_s8 = inlined_call_operand.vmem [shape: f32[1,128], index: 8, kind: input, shape index: {}]   ;;  %s870_s9 = inlined_call_operand.vmem [shape: f32[128,32], index: 9, kind: input, shape index: {}]   ;;  %s871_s10 = inlined_call_operand.vmem [shape: f32[1,32], index: 10, kind: input, shape index: {}]   ;;  %s872_s11 = inlined_call_operand.hbm [shape: f32[8,32], index: 11, kind: output, shape index: {}]  }
   0x1   :  { %17 = vsyncpa [#allocation6], 0 }
   0x2   :  { %18 = vsyncpa [#allocation4], 0  ;;  %s617_s17 = smov [#allocation2]   ;;  %s618_s19 = smov [#allocation5]  }
   0x3   :  { %s31_s18 = sshll.u32 %s617_s17, 4  ;;  %s41_s20 = sshll.u32 %s618_s19, 4  ;;  %s32_s18 = int_to_ptr.vmem [resolvable:$true] %s31_s18  ;;  %s42_s20 = int_to_ptr.vmem [resolvable:$true] %s41_s20 }
   0x4   :  { %s559_s21 = scalar_lea.vmem %s32_s18, 16  ;;  %s563_s22 = scalar_lea.vmem %s32_s18, 32 }
   0x5   :  { %p560_p0 = scmp.ne.s32.totalorder %s32_s18, %s559_s21  ;;  %p564_p1 = scmp.lt.s32.totalorder %s32_s18, %s32_s18 }
   0x6   :  { %p565_p2 = scmp.lt.s32.totalorder %s563_s22, %s559_s21 }
   0x8   :  { %p566_p3 = por %p565_p2, %p564_p1 }
   0xa   :  { %p567_p4 = pnand %p566_p3, %p560_p0 }
   0xc   :  { %570 = shalt.err (!%p567_p4)
}
   0xd   :  { %34 = dma.hbm_to_vmem [thread:$0]  %s864_s3, 16, %s32_s18, [#allocation3]  }
   0xe   :  { %s579_s25 = scalar_lea.vmem %s42_s20, 16  ;;  %s583_s26 = scalar_lea.vmem %s42_s20, 32 }
   0xf   :  { %p580_p5 = scmp.ne.s32.totalorder %s42_s20, %s579_s25  ;;  %p584_p6 = scmp.lt.s32.totalorder %s42_s20, %s42_s20 }
  0x10   :  { %p585_p7 = scmp.lt.s32.totalorder %s583_s26, %s579_s25 }
  0x12   :  { %p586_p8 = por %p585_p7, %p584_p6 }
  0x14   :  { %p587_p9 = pnand %p586_p8, %p580_p5 }
  0x16   :  { %590 = shalt.err (!%p587_p9)
}
  0x17   :  { %44 = dma.hbm_to_vmem [thread:$0]  %s865_s4, 16, %s42_s20, [#allocation6]  }
  0x18   :  { %611 = dma.done.wait [#allocation3], 16  }
  0x19   :  { %612 = vsyncadd [#allocation3], 4294967280 }
  0x1a   :  { %613 = dma.done.wait [#allocation6], 16  }
  0x1b   :  { %614 = vsyncadd [#allocation6], 4294967280  ;;  %v619_v0 = vmov 0.0   ;;  %vm620_vm0 = vmmov 0   ;;  %v67_v1 = vld [vmem:[%s862_s1 + $0x18] sm:$0xff]  ;;  %v66_v2 = vld [vmem:[%s862_s1 + $0x10] sm:$0xff] }
  0x1c   :  { %461 = vmatprep.subr.mxu0 %v619_v0  ;;  %469 = vmatprep.mubr.msk.f32.mxu0 %vm620_vm0, %v619_v0  ;;  %v65_v3 = vld [vmem:[%s862_s1 + $0x8] sm:$0xff]  ;;  %v64_v4 = vld [vmem:[%s862_s1] sm:$0xff]  ;;  %vm75_vm1 = vcmask 261120   ;;  %v195_v11 = vld [vmem:[%s866_s5 + $0x78] sm:$0xff]  ;;  %s621_s15 = smov [#allocation7]  }
  0x1d   :  { %472 = vmatprep.subr.mxu1 %v619_v0  ;;  %504 = vmatprep.mubr.msk.f32.mxu1 %vm620_vm0, %v619_v0  ;;  %v63_v5 = vld [vmem:[%s861_s0] sm:$0xff]  ;;  %v194_v12 = vld [vmem:[%s866_s5 + $0x70] sm:$0xff]  ;;  %v193_v13 = vld [vmem:[%s866_s5 + $0x68] sm:$0xff]  ;;  %s404_s16 = sshll.u32 %s621_s15, 4  ;;  %s405_s16 = int_to_ptr.vmem [resolvable:$true] %s404_s16 }
  0x1e   :  { %462 = vmatpush3.msra.mxu0 %v67_v1  ;;  %v414_v6 = vld [vmem:[%s863_s2] ss:$0 sm:$0xff]  ;;  %473 = vmatpush3.msra.mxu1 %v195_v11  ;;  %v191_v19 = vld [vmem:[%s866_s5 + $0x58] sm:$0xff]  ;;  %v190_v20 = vld [vmem:[%s866_s5 + $0x50] sm:$0xff]  ;;  %p596_p11 = scmp.lt.s32.totalorder %s405_s16, %s405_s16 }
  0x1f   :  { %463 = vmatprep.subr.mxu0 %v619_v0  ;;  %474 = vmatprep.subr.mxu1 %v619_v0  ;;  %v192_v18 = vld [vmem:[%s866_s5 + $0x60] sm:$0xff]  ;;  %v189_v21 = vld [vmem:[%s866_s5 + $0x48] sm:$0xff]  ;;  %v187_v23 = vld [vmem:[%s866_s5 + $0x38] sm:$0xff] }
  0x20   :  { %464 = vmatpush3.msra.mxu0 %v66_v2  ;;  %475 = vmatpush3.msra.mxu1 %v194_v12  ;;  %v188_v22 = vld [vmem:[%s866_s5 + $0x40] sm:$0xff]  ;;  %v186_v24 = vld [vmem:[%s866_s5 + $0x30] sm:$0xff]  ;;  %v185_v25 = vld [vmem:[%s866_s5 + $0x28] sm:$0xff] }
  0x21   :  { %465 = vmatprep.subr.mxu0 %v619_v0  ;;  %476 = vmatprep.subr.mxu1 %v619_v0  ;;  %v184_v26 = vld [vmem:[%s866_s5 + $0x20] sm:$0xff]  ;;  %v183_v27 = vld [vmem:[%s866_s5 + $0x18] sm:$0xff]  ;;  %v182_v28 = vld [vmem:[%s866_s5 + $0x10] sm:$0xff] }
  0x22   :  { %466 = vmatpush3.msra.mxu0 %v65_v3  ;;  %477 = vmatpush3.msra.mxu1 %v193_v13  ;;  %v181_v29 = vld [vmem:[%s866_s5 + $0x8] sm:$0xff]  ;;  %v180_v30 = vld [vmem:[%s866_s5] sm:$0xff]  ;;  %v319_v48 = vld [vmem:[%s870_s9 + $0x78] sm:$0xff] }
  0x23   :  { %467 = vmatprep.subr.mxu0 %v619_v0  ;;  %478 = vmatprep.subr.mxu1 %v619_v0  ;;  %v416_v38 = vld [vmem:[#allocation2] ss:$0 sm:$0xff]  ;;  %v417_v40 = vld [vmem:[#allocation5] ss:$0 sm:$0xff]  ;;  %v318_v49 = vld [vmem:[%s870_s9 + $0x70] sm:$0xff] }
  0x24   :  { %468 = vmatpush3.msra.mxu0 %v64_v4  ;;  %479 = vmatpush3.msra.mxu1 %v192_v18  ;;  %v418_v43 = vld [vmem:[%s867_s6] ss:$0 sm:$0xff]  ;;  %v317_v50 = vld [vmem:[%s870_s9 + $0x68] sm:$0xff]  ;;  %v315_v56 = vld [vmem:[%s870_s9 + $0x58] sm:$0xff] }
  0x25   :  { %470 = vmatmul.mubr.msk.f32.vlgmr.msra.gmra.mxu0 %vm75_vm1, %v63_v5  ;;  %507 = vmatprep.subr.mxu0 %v619_v0  ;;  %v316_v55 = vld [vmem:[%s870_s9 + $0x60] sm:$0xff]  ;;  %v314_v57 = vld [vmem:[%s870_s9 + $0x50] sm:$0xff]  ;;  %v313_v58 = vld [vmem:[%s870_s9 + $0x48] sm:$0xff] }
  0x26   :  { %539 = vmatprep.mubr.msk.f32.mxu0 %vm620_vm0, %v619_v0  ;;  %480 = vmatprep.subr.mxu1 %v619_v0  ;;  %v312_v59 = vld [vmem:[%s870_s9 + $0x40] sm:$0xff]  ;;  %v311_v60 = vld [vmem:[%s870_s9 + $0x38] sm:$0xff]  ;;  %v310_v61 = vld [vmem:[%s870_s9 + $0x30] sm:$0xff] }
  0x27   :  { %481 = vmatpush3.msra.mxu1 %v191_v19  ;;  %508 = vmatpush3.msra.mxu0 %v319_v48  ;;  %v309_v62 = vld [vmem:[%s870_s9 + $0x28] sm:$0xff]  ;;  %v308_v63 = vld [vmem:[%s870_s9 + $0x20] sm:$0xff]  ;;  %v307_v1 = vld [vmem:[%s870_s9 + $0x18] sm:$0xff] }
  0x28   :  { %482 = vmatprep.subr.mxu1 %v619_v0  ;;  %509 = vmatprep.subr.mxu0 %v619_v0  ;;  %v306_v2 = vld [vmem:[%s870_s9 + $0x10] sm:$0xff]  ;;  %v305_v3 = vld [vmem:[%s870_s9 + $0x8] sm:$0xff]  ;;  %v304_v4 = vld [vmem:[%s870_s9] sm:$0xff] }
  0x29   :  { %483 = vmatpush3.msra.mxu1 %v190_v20  ;;  %510 = vmatpush3.msra.mxu0 %v318_v49  ;;  %v419_v12 = vld [vmem:[%s868_s7] ss:$0 sm:$0xff]  ;;  %s591_s7 = scalar_lea.vmem %s405_s16, 128 }
  0x2a   :  { %484 = vmatprep.subr.mxu1 %v619_v0  ;;  %511 = vmatprep.subr.mxu0 %v619_v0  ;;  %p592_p10 = scmp.ne.s32.totalorder %s405_s16, %s591_s7  ;;  %p597_p12 = scmp.lt.s32.totalorder %s591_s7, %s591_s7 }
  0x2b   :  { %485 = vmatpush3.msra.mxu1 %v189_v21  ;;  %512 = vmatpush3.msra.mxu0 %v317_v50 }
  0x2c   :  { %486 = vmatprep.subr.mxu1 %v619_v0  ;;  %513 = vmatprep.subr.mxu0 %v619_v0  ;;  %p598_p13 = por %p597_p12, %p596_p11 }
  0x2d   :  { %487 = vmatpush3.msra.mxu1 %v188_v22  ;;  %514 = vmatpush3.msra.mxu0 %v316_v55 }
  0x2e   :  { %488 = vmatprep.subr.mxu1 %v619_v0  ;;  %515 = vmatprep.subr.mxu0 %v619_v0  ;;  %p599_p0 = pnand %p598_p13, %p592_p10 }
  0x2f   :  { %489 = vmatpush3.msra.mxu1 %v187_v23  ;;  %516 = vmatpush3.msra.mxu0 %v315_v56 }
  0x30   :  { %490 = vmatprep.subr.mxu1 %v619_v0  ;;  %517 = vmatprep.subr.mxu0 %v619_v0 }
  0x31   :  { %491 = vmatpush3.msra.mxu1 %v186_v24  ;;  %518 = vmatpush3.msra.mxu0 %v314_v57 }
  0x32   :  { %492 = vmatprep.subr.mxu1 %v619_v0  ;;  %519 = vmatprep.subr.mxu0 %v619_v0 }
  0x33   :  { %493 = vmatpush3.msra.mxu1 %v185_v25  ;;  %520 = vmatpush3.msra.mxu0 %v313_v58 }
  0x34   :  { %494 = vmatprep.subr.mxu1 %v619_v0  ;;  %521 = vmatprep.subr.mxu0 %v619_v0 }
  0x35   :  { %495 = vmatpush3.msra.mxu1 %v184_v26  ;;  %522 = vmatpush3.msra.mxu0 %v312_v59 }
  0x36   :  { %496 = vmatprep.subr.mxu1 %v619_v0  ;;  %523 = vmatprep.subr.mxu0 %v619_v0 }
  0x37   :  { %497 = vmatpush3.msra.mxu1 %v183_v27  ;;  %524 = vmatpush3.msra.mxu0 %v311_v60 }
  0x38   :  { %498 = vmatprep.subr.mxu1 %v619_v0  ;;  %525 = vmatprep.subr.mxu0 %v619_v0 }
  0x39   :  { %499 = vmatpush3.msra.mxu1 %v182_v28  ;;  %526 = vmatpush3.msra.mxu0 %v310_v61 }
  0x3a   :  { %500 = vmatprep.subr.mxu1 %v619_v0  ;;  %527 = vmatprep.subr.mxu0 %v619_v0 }
  0x3b   :  { %501 = vmatpush3.msra.mxu1 %v181_v29  ;;  %528 = vmatpush3.msra.mxu0 %v309_v62 }
  0x3c   :  { %502 = vmatprep.subr.mxu1 %v619_v0  ;;  %529 = vmatprep.subr.mxu0 %v619_v0 }
  0x3d   :  { %503 = vmatpush3.msra.mxu1 %v180_v30  ;;  %530 = vmatpush3.msra.mxu0 %v308_v63 }
  0x3e   :  { %531 = vmatprep.subr.mxu0 %v619_v0 }
  0x3f   :  { %532 = vmatpush3.msra.mxu0 %v307_v1 }
  0x40   :  { %533 = vmatprep.subr.mxu0 %v619_v0 }
  0x41   :  { %534 = vmatpush3.msra.mxu0 %v306_v2 }
  0x42   :  { %535 = vmatprep.subr.mxu0 %v619_v0 }
  0x43   :  { %536 = vmatpush3.msra.mxu0 %v305_v3 }
  0x44   :  { %537 = vmatprep.subr.mxu0 %v619_v0 }
  0x45   :  { %538 = vmatpush3.msra.mxu0 %v304_v4 }
  0xe5   :  { %v145_v7 = vpop.f32.mrf.mxu0 }
  0xe6   :  { %v146_v8 = vadd.f32 %v414_v6, %v145_v7 }
  0xe7   :  { %v471_v9 = vpop.f32.mrf.mxu0 }
  0xe8   :  { %v149_v10 = vmax.f32 %v146_v8, 0.0 }
  0xea   :  { %150 = vadd.xlane.f32.xlu0 %v149_v10 }
 0x173   :  { %v151_v14 = vpop.xlane.xlu0 %150 }
 0x174   :  { %v152_v15 = vmul.f32 0.015625, %v151_v14  ;;  %v420_v14 = vld [vmem:[%s869_s8] ss:$0 sm:$0xff] }
 0x176   :  { %v153_v16 = vsub.f32 %v149_v10, %v152_v15  ;;  %v157_v31 = vmul.f32 %v152_v15, %v152_v15 }
 0x178   :  { %v154_v17 = vmul.f32 %v153_v16, %v153_v16  ;;  %v158_v32 = vmul.f32 64.0, %v157_v31 }
 0x17a   :  { %155 = vadd.xlane.f32.xlu0 %v154_v17 }
 0x203   :  { %v156_v33 = vpop.xlane.xlu0 %155 }
 0x204   :  { %v159_v34 = vsub.f32 %v156_v33, %v158_v32 }
 0x206   :  { %v160_v35 = vmul.f32 0.015625, %v159_v34 }
 0x208   :  { %v161_v36 = vadd.f32 1e-05, %v160_v35 }
 0x20a   :  { %547 = vrsqrt.f32 %v161_v36 }
 0x217   :  { %v548_v37 = vpop.eup %547 }
 0x218   :  { %v163_v39 = vmul.f32 %v548_v37, %v153_v16  ;;  %v421_v16 = vld [vmem:[%s871_s10] ss:$0 sm:$0xff] }
 0x21a   :  { %v171_v41 = vmul.f32 %v416_v38, %v163_v39 }
 0x21c   :  { %v179_v42 = vadd.f32 %v417_v40, %v171_v41 }
 0x21e   :  { %505 = vmatmul.mubr.f32.vlgmr.msra.gmra.mxu1 %v179_v42 }
 0x2de   :  { %v269_v44 = vpop.f32.mrf.mxu1 }
 0x2df   :  { %v270_v45 = vadd.f32 %v418_v43, %v269_v44 }
 0x2e0   :  { %v506_v46 = vpop.f32.mrf.mxu1 }
 0x2e1   :  { %v273_v47 = vmax.f32 %v270_v45, 0.0 }
 0x2e3   :  { %274 = vadd.xlane.f32.xlu1 %v273_v47 }
 0x36c   :  { %v275_v51 = vpop.xlane.xlu1 %274 }
 0x36d   :  { %v276_v52 = vmul.f32 0.015625, %v275_v51 }
 0x36f   :  { %v277_v53 = vsub.f32 %v273_v47, %v276_v52  ;;  %v281_v5 = vmul.f32 %v276_v52, %v276_v52 }
 0x371   :  { %v278_v54 = vmul.f32 %v277_v53, %v277_v53  ;;  %v282_v6 = vmul.f32 64.0, %v281_v5 }
 0x373   :  { %279 = vadd.xlane.f32.xlu1 %v278_v54 }
 0x3fc   :  { %v280_v7 = vpop.xlane.xlu1 %279 }
 0x3fd   :  { %v283_v8 = vsub.f32 %v280_v7, %v282_v6 }
 0x3ff   :  { %v284_v9 = vmul.f32 0.015625, %v283_v8 }
 0x401   :  { %v285_v10 = vadd.f32 1e-05, %v284_v9 }
 0x403   :  { %549 = vrsqrt.f32 %v285_v10 }
 0x410   :  { %v550_v11 = vpop.eup %549 }
 0x411   :  { %v287_v13 = vmul.f32 %v550_v11, %v277_v53 }
 0x413   :  { %v295_v15 = vmul.f32 %v419_v12, %v287_v13 }
 0x415   :  { %v303_v0 = vadd.f32 %v420_v14, %v295_v15 }
 0x417   :  { %540 = vmatmul.mubr.f32.vlgmr.msra.gmra.mxu0 %v303_v0 }
 0x4d7   :  { %v393_v17 = vpop.f32.mrf.mxu0 }
 0x4d8   :  { %v394_v18 = vadd.f32 %v421_v16, %v393_v17 }
 0x4d9   :  { %v541_v19 = vpop.f32.mrf.mxu0 }
 0x4da   :  { %397 = vst.msk [vmem:[#allocation7] sm:$0xff] %vm75_vm1, %v394_v18 }
 0x4db   :  { %602 = shalt.err (!%p599_p0)
}
 0x4dc   :  { %407 = dma.vmem_to_hbm [thread:$0]  %s405_s16, 128, %s872_s11, [#allocation4]  }
 0x4dd   :  { %615 = dma.done.wait [#allocation4], 128  }
 0x4de   :  { %616 = vsyncadd [#allocation4], 4294967168 }
 0x4df   :  { %411 = vsyncpa [#allocation3], 1 }
 0x4e0   :  { %412 = vsyncpa [#allocation6], 1 }
 0x4e1   :  { %413 = vsyncpa [#allocation4], 1 }

</bundles_post_ra>
